<compile_context>
chip_gen: v7x
topology: tpu7x:2x2x1
jax: 0.10.0
libtpu: 0.0.40
codegen_flags: <defaults>
</compile_context>

<pallas_src>
import jax
import jax.numpy as jnp
from jax.experimental import pallas as pl
from jax.experimental.pallas import tpu as pltpu


_EPS = 1e-5
_NEG_SLOPE = 0.2


def _round_up(x, m):
    return ((x + m - 1) // m) * m


# --------------- Pass 1: conv-as-matmul + per-tile BN partial stats ----------
def _conv_stats_kernel(a_ref, w_ref, y_ref, stats_ref):
    # a_ref:     (TM, Kp)  bf16 im2col patch tile
    # w_ref:     (Kp, Cp)  bf16 reshaped conv weight (zero-padded)
    # y_ref:     (TM, Cp)  f32  conv output tile
    # stats_ref: (8,  Cp)  f32  row 0 = per-channel sum, row 1 = sum of squares
    y = jnp.dot(a_ref[...], w_ref[...], preferred_element_type=jnp.float32)
    y_ref[...] = y
    s = jnp.sum(y, axis=0, keepdims=True)           # (1, Cp)
    ss = jnp.sum(y * y, axis=0, keepdims=True)      # (1, Cp)
    pad = jnp.zeros((6, y.shape[1]), jnp.float32)
    stats_ref[...] = jnp.concatenate([s, ss, pad], axis=0)


# --------------- Pass 2: folded BN affine + LeakyReLU ------------------------
def _bn_lrelu_kernel(y_ref, scale_ref, shift_ref, o_ref):
    # y_ref: (TM, Cp) f32 ; scale/shift: (1, Cp) f32 ; o_ref: (TM, Cp) f32
    z = y_ref[...] * scale_ref[...] + shift_ref[...]
    o_ref[...] = jnp.maximum(z, _NEG_SLOPE * z).astype(o_ref.dtype)


def _im2col(x_nchw, kh=4, kw=4, stride=2, pad=1):
    """Plain-JAX glue: NCHW -> (N*Ho*Wo, Cin*kh*kw) in bf16.  Column ordering
    (Cin slowest, kh, kw fastest) matches PyTorch weight.reshape(Cout, -1)."""
    n, c, h, w = x_nchw.shape
    ho = (h + 2 * pad - kh) // stride + 1
    wo = (w + 2 * pad - kw) // stride + 1
    xp = jnp.pad(x_nchw.astype(jnp.bfloat16),
                 ((0, 0), (0, 0), (pad, pad), (pad, pad)))
    patches = []
    for i in range(kh):
        for j in range(kw):
            sl = xp[:, :, i:i + stride * (ho - 1) + 1:stride,
                          j:j + stride * (wo - 1) + 1:stride]  # (N, C, Ho, Wo)
            patches.append(sl)
    # (kh*kw, N, C, Ho, Wo) -> (N, Ho, Wo, C, kh*kw)
    p = jnp.stack(patches, axis=0)
    p = jnp.transpose(p, (1, 3, 4, 2, 0))
    return p.reshape(n * ho * wo, c * kh * kw), (n, ho, wo)


def downsample_forward(x_nchw, conv_w, conv_b, bn_gamma, bn_beta):
    """x_nchw: (N, Cin, H, W); conv_w: (Cout, Cin, 4, 4); returns NCHW f32.

    conv_b is accepted for API parity but unused: training-mode BatchNorm
    subtracts the batch mean, which cancels the per-channel conv bias exactly.
    """
    del conv_b
    cout = conv_w.shape[0]
    a, (n, ho, wo) = _im2col(x_nchw)                    # (M, K) bf16
    m, k = a.shape

    kp = _round_up(k, 128)                              # MXU-shaped contraction
    cp = _round_up(cout, 128)                           # lane-dense output
    # Row-tile size: largest multiple of 8 (<=512) whose double-buffered tiles
    # fit a v7x-safe VMEM budget (~16 MiB), given the per-row tile bytes.
    budget = 16 * 1024 * 1024
    per_row = 2 * (kp * 2) + 2 * (cp * 4) + 2 * (cp * 4)   # a(bf16) + y + out (dbl-buf)
    tm = max(8, min(512, (budget // per_row) // 8 * 8))
    tm = min(tm, _round_up(m, 8))
    mp = _round_up(m, tm)
    num_tiles = mp // tm

    # Zero-pad operands (bf16 into the MXU, f32 accumulation inside the kernel).
    a_pad = jnp.pad(a, ((0, mp - m), (0, kp - k)))
    wmat = conv_w.reshape(cout, -1).T.astype(jnp.bfloat16)          # (K, Cout)
    w_pad = jnp.pad(wmat, ((0, kp - k), (0, cp - cout)))

    cparams = pltpu.CompilerParams(
        dimension_semantics=("parallel",),
        vmem_limit_bytes=32 * 1024 * 1024,
    )

    # ---- Pass 1: conv output tiles + per-tile channel stats -----------------
    y_pad, stats = pl.pallas_call(
        _conv_stats_kernel,
        out_shape=(
            jax.ShapeDtypeStruct((mp, cp), jnp.float32),
            jax.ShapeDtypeStruct((num_tiles, 8, cp), jnp.float32),
        ),
        grid=(num_tiles,),
        in_specs=[
            pl.BlockSpec((tm, kp), lambda i: (i, 0)),
            pl.BlockSpec((kp, cp), lambda i: (0, 0)),
        ],
        out_specs=(
            pl.BlockSpec((tm, cp), lambda i: (i, 0)),
            pl.BlockSpec((None, 8, cp), lambda i: (i, 0, 0)),
        ),
        compiler_params=cparams,
    )(a_pad, w_pad)

    # ---- Tiny cross-tile reduction + fold BN affine (plain JAX, Cp-sized) ---
    ch_sum = jnp.sum(stats[:, 0, :], axis=0)            # (Cp,)
    ch_sumsq = jnp.sum(stats[:, 1, :], axis=0)          # (Cp,)
    inv_m = 1.0 / float(m)                              # divide by TRUE row count
    mean = ch_sum * inv_m
    var = jnp.maximum(ch_sumsq * inv_m - mean * mean, 0.0)   # biased variance
    gamma_pad = jnp.pad(bn_gamma.astype(jnp.float32), (0, cp - cout),
                        constant_values=1.0)
    beta_pad = jnp.pad(bn_beta.astype(jnp.float32), (0, cp - cout))
    scale = gamma_pad * jax.lax.rsqrt(var + _EPS)
    shift = beta_pad - mean * scale

    # ---- Pass 2: normalize (single FMA) + LeakyReLU --------------------------
    out_pad = pl.pallas_call(
        _bn_lrelu_kernel,
        out_shape=jax.ShapeDtypeStruct((mp, cp), jnp.float32),
        grid=(num_tiles,),
        in_specs=[
            pl.BlockSpec((tm, cp), lambda i: (i, 0)),
            pl.BlockSpec((1, cp), lambda i: (0, 0)),
            pl.BlockSpec((1, cp), lambda i: (0, 0)),
        ],
        out_specs=pl.BlockSpec((tm, cp), lambda i: (i, 0)),
        compiler_params=cparams,
    )(y_pad, scale.reshape(1, cp), shift.reshape(1, cp))

    # Strip padding, (M, Cout) -> (N, Ho, Wo, Cout) -> NCHW (PyTorch convention).
    out = out_pad[:m, :cout].reshape(n, ho, wo, cout).transpose(0, 3, 1, 2)
    return out


downsample_forward_jit = jax.jit(downsample_forward)


if __name__ == "__main__":
    N, Cin, H, W = 2, 4, 16, 16
    Cout = 8

    key = jax.random.PRNGKey(0)
    kx, kw, kb = jax.random.split(key, 3)

    x = jax.random.normal(kx, (N, Cin, H, W), dtype=jnp.float32)

    # Deterministic parameter init (synthetic; shapes match nn.Conv2d/BatchNorm2d)
    conv_w = 0.1 * jax.random.normal(kw, (Cout, Cin, 4, 4), dtype=jnp.float32)
    conv_b = 0.05 * jax.random.normal(kb, (Cout,), dtype=jnp.float32)
    bn_gamma = jnp.ones((Cout,), dtype=jnp.float32)   # PyTorch BN default init
    bn_beta = jnp.zeros((Cout,), dtype=jnp.float32)

    y = downsample_forward_jit(x, conv_w, conv_b, bn_gamma, bn_beta)
    jax.block_until_ready(y)
    assert y.shape == (N, Cout, H // 2, W // 2), y.shape
    assert bool(jnp.all(jnp.isfinite(y)))
    print("KERNEL_OK")
</pallas_src>

<mosaic_0001>
module attributes {stable_mosaic.version = 11 : i64} {
  func.func @_conv_stats_kernel(%arg0: i32, %arg1: memref<128x128xbf16, #tpu.memory_space<vmem>>, %arg2: memref<128x128xbf16, #tpu.memory_space<vmem>>, %arg3: memref<128x128xf32, #tpu.memory_space<vmem>>, %arg4: memref<1x8x128xf32, #tpu.memory_space<vmem>>) attributes {dimension_semantics = [#tpu.dimension_semantics<parallel>], iteration_bounds = array<i64: 1>, scalar_prefetch = 0 : i64, scratch_operands = 0 : i64, tpu.core_type = #tpu.core_type<tc>, window_params = [{transform_indices = @transform_0, window_bounds = array<i64: 128, 128>}, {pipeline_mode = #tpu.pipeline_mode<synchronous>, transform_indices = @transform_1, window_bounds = array<i64: 128, 128>}, {transform_indices = @transform_2, window_bounds = array<i64: 128, 128>}, {transform_indices = @transform_3, window_bounds = array<i64: 1, 8, 128>}]} {
    %c0 = arith.constant 0 : index
    %c0_0 = arith.constant 0 : index
    %0 = vector.load %arg1[%c0, %c0_0] : memref<128x128xbf16, #tpu.memory_space<vmem>>, vector<128x128xbf16>
    %c0_1 = arith.constant 0 : index
    %c0_2 = arith.constant 0 : index
    %1 = vector.load %arg2[%c0_1, %c0_2] : memref<128x128xbf16, #tpu.memory_space<vmem>>, vector<128x128xbf16>
    %cst = arith.constant dense<0.000000e+00> : vector<128x128xf32>
    %2 = tpu.matmul %0, %1, %cst {dimension_numbers = #tpu.dot_dimension_numbers<[1], [0], [0], [1], [0, 0, 1, 1], [], []>} : vector<128x128xbf16>, vector<128x128xbf16>, vector<128x128xf32> -> vector<128x128xf32>
    %c0_3 = arith.constant 0 : index
    %c0_4 = arith.constant 0 : index
    %3 = vector.load %arg3[%c0_3, %c0_4] : memref<128x128xf32, #tpu.memory_space<vmem>>, vector<128x128xf32>
    tpu.vector_store %arg3[%c0_3, %c0_4], %2 {strides = array<i32>} : memref<128x128xf32, #tpu.memory_space<vmem>>, vector<128x128xf32>,
    %cst_5 = arith.constant dense<0.000000e+00> : vector<128xf32>
    %4 = vector.multi_reduction <add>, %2, %cst_5 [0] : vector<128x128xf32> to vector<128xf32>
    %5 = vector.shape_cast %4 : vector<128xf32> to vector<1x128xf32>
    %6 = arith.mulf %2, %2 : vector<128x128xf32>
    %cst_6 = arith.constant dense<0.000000e+00> : vector<128xf32>
    %7 = vector.multi_reduction <add>, %6, %cst_6 [0] : vector<128x128xf32> to vector<128xf32>
    %8 = vector.shape_cast %7 : vector<128xf32> to vector<1x128xf32>
    %cst_7 = arith.constant 0.000000e+00 : f32
    %9 = vector.broadcast %cst_7 : f32 to vector<6x128xf32>
    %10 = tpu.concatenate %5, %8, %9 in 0 : vector<1x128xf32>, vector<1x128xf32>, vector<6x128xf32> -> vector<8x128xf32>
    %c0_8 = arith.constant 0 : index
    %c0_9 = arith.constant 0 : index
    %c0_10 = arith.constant 0 : index
    %11 = vector.load %arg4[%c0_8, %c0_9, %c0_10] : memref<1x8x128xf32, #tpu.memory_space<vmem>>, vector<1x8x128xf32>
    %12 = vector.shape_cast %11 : vector<1x8x128xf32> to vector<8x128xf32>
    %13 = vector.shape_cast %10 : vector<8x128xf32> to vector<1x8x128xf32>
    tpu.vector_store %arg4[%c0_8, %c0_9, %c0_10], %13 {strides = array<i32>} : memref<1x8x128xf32, #tpu.memory_space<vmem>>, vector<1x8x128xf32>,
    return
  }
  func.func @transform_0(%arg0: i32) -> (i32, i32) {
    %c0_i32 = arith.constant 0 : i32
    %c0_i32_0 = arith.constant 0 : i32
    return %arg0, %c0_i32 : i32, i32
  }
  func.func @transform_1(%arg0: i32) -> (i32, i32) {
    %c0_i32 = arith.constant 0 : i32
    %c0_i32_0 = arith.constant 0 : i32
    %c0_i32_1 = arith.constant 0 : i32
    return %c0_i32, %c0_i32_0 : i32, i32
  }
  func.func @transform_2(%arg0: i32) -> (i32, i32) {
    %c0_i32 = arith.constant 0 : i32
    %c0_i32_0 = arith.constant 0 : i32
    return %arg0, %c0_i32 : i32, i32
  }
  func.func @transform_3(%arg0: i32) -> (i32, i32, i32) {
    %c0_i32 = arith.constant 0 : i32
    %c0_i32_0 = arith.constant 0 : i32
    %c0_i32_1 = arith.constant 0 : i32
    return %arg0, %c0_i32, %c0_i32_0 : i32, i32, i32
  }
}

module attributes {stable_mosaic.version = 11 : i64} {
  func.func @_bn_lrelu_kernel(%arg0: i32, %arg1: memref<128x128xf32, #tpu.memory_space<vmem>>, %arg2: memref<1x128xf32, #tpu.memory_space<vmem>>, %arg3: memref<1x128xf32, #tpu.memory_space<vmem>>, %arg4: memref<128x128xf32, #tpu.memory_space<vmem>>) attributes {dimension_semantics = [#tpu.dimension_semantics<parallel>], iteration_bounds = array<i64: 1>, scalar_prefetch = 0 : i64, scratch_operands = 0 : i64, tpu.core_type = #tpu.core_type<tc>, window_params = [{transform_indices = @transform_0, window_bounds = array<i64: 128, 128>}, {pipeline_mode = #tpu.pipeline_mode<synchronous>, transform_indices = @transform_1, window_bounds = array<i64: 1, 128>}, {pipeline_mode = #tpu.pipeline_mode<synchronous>, transform_indices = @transform_2, window_bounds = array<i64: 1, 128>}, {transform_indices = @transform_3, window_bounds = array<i64: 128, 128>}]} {
    %c0 = arith.constant 0 : index
    %c0_0 = arith.constant 0 : index
    %0 = vector.load %arg1[%c0, %c0_0] : memref<128x128xf32, #tpu.memory_space<vmem>>, vector<128x128xf32>
    %c0_1 = arith.constant 0 : index
    %c0_2 = arith.constant 0 : index
    %1 = vector.load %arg2[%c0_1, %c0_2] : memref<1x128xf32, #tpu.memory_space<vmem>>, vector<1x128xf32>
    %2 = vector.broadcast %1 : vector<1x128xf32> to vector<128x128xf32>
    %3 = arith.mulf %0, %2 : vector<128x128xf32>
    %c0_3 = arith.constant 0 : index
    %c0_4 = arith.constant 0 : index
    %4 = vector.load %arg3[%c0_3, %c0_4] : memref<1x128xf32, #tpu.memory_space<vmem>>, vector<1x128xf32>
    %5 = vector.broadcast %4 : vector<1x128xf32> to vector<128x128xf32>
    %6 = arith.addf %3, %5 : vector<128x128xf32>
    %cst = arith.constant 2.000000e-01 : f32
    %7 = vector.broadcast %cst : f32 to vector<128x128xf32>
    %8 = arith.mulf %7, %6 : vector<128x128xf32>
    %9 = arith.maximumf %6, %8 : vector<128x128xf32>
    %c0_5 = arith.constant 0 : index
    %c0_6 = arith.constant 0 : index
    %10 = vector.load %arg4[%c0_5, %c0_6] : memref<128x128xf32, #tpu.memory_space<vmem>>, vector<128x128xf32>
    tpu.vector_store %arg4[%c0_5, %c0_6], %9 {strides = array<i32>} : memref<128x128xf32, #tpu.memory_space<vmem>>, vector<128x128xf32>,
    return
  }
  func.func @transform_0(%arg0: i32) -> (i32, i32) {
    %c0_i32 = arith.constant 0 : i32
    %c0_i32_0 = arith.constant 0 : i32
    return %arg0, %c0_i32 : i32, i32
  }
  func.func @transform_1(%arg0: i32) -> (i32, i32) {
    %c0_i32 = arith.constant 0 : i32
    %c0_i32_0 = arith.constant 0 : i32
    %c0_i32_1 = arith.constant 0 : i32
    return %c0_i32, %c0_i32_0 : i32, i32
  }
  func.func @transform_2(%arg0: i32) -> (i32, i32) {
    %c0_i32 = arith.constant 0 : i32
    %c0_i32_0 = arith.constant 0 : i32
    %c0_i32_1 = arith.constant 0 : i32
    return %c0_i32, %c0_i32_0 : i32, i32
  }
  func.func @transform_3(%arg0: i32) -> (i32, i32) {
    %c0_i32 = arith.constant 0 : i32
    %c0_i32_0 = arith.constant 0 : i32
    return %arg0, %c0_i32 : i32, i32
  }
}

</mosaic_0001>

<bundles_post_ra>
// kernel: downsample_forward.3
= control target key start
LH: loop header
LB: loop body
LE: loop exit
PB: predicated region body
PF: predicated region fallthrough
CT: control target
= control target key end

     0   :  { %s288_s0 = inlined_call_operand.vmem [shape: f32[128,128], index: 0, kind: input, shape index: {}]   ;;  %s289_s1 = inlined_call_operand.vmem [shape: f32[1,128], index: 1, kind: input, shape index: {}]   ;;  %s290_s2 = inlined_call_operand.vmem [shape: f32[1,128], index: 2, kind: input, shape index: {}]   ;;  %s291_s3 = inlined_call_operand.vmem [shape: f32[128,128], index: 3, kind: output, shape index: {}]  }
   0x1   :  { %v14_v0 = vld [vmem:[%s288_s0] sm:$0xff]  ;;  %v15_v4 = vld [vmem:[%s288_s0 + $0x8] sm:$0xff]  ;;  %v16_v5 = vld [vmem:[%s288_s0 + $0x10] sm:$0xff] }
   0x2   :  { %v156_v1 = vld [vmem:[%s289_s1] ss:$0 sm:$0xff]  ;;  %v17_v6 = vld [vmem:[%s288_s0 + $0x18] sm:$0xff]  ;;  %v19_v11 = vld [vmem:[%s288_s0 + $0x28] sm:$0xff] }
   0x3   :  { %v161_v2 = vld [vmem:[%s290_s2] ss:$0 sm:$0xff]  ;;  %v37_v3 = vmul.f32 %v156_v1, %v14_v0  ;;  %v38_v7 = vmul.f32 %v156_v1, %v15_v4  ;;  %v39_v8 = vmul.f32 %v156_v1, %v16_v5  ;;  %v40_v9 = vmul.f32 %v156_v1, %v17_v6  ;;  %v20_v12 = vld [vmem:[%s288_s0 + $0x30] sm:$0xff]  ;;  %v21_v17 = vld [vmem:[%s288_s0 + $0x38] sm:$0xff] }
   0x4   :  { %v18_v10 = vld [vmem:[%s288_s0 + $0x20] sm:$0xff]  ;;  %v42_v15 = vmul.f32 %v156_v1, %v19_v11  ;;  %v43_v16 = vmul.f32 %v156_v1, %v20_v12  ;;  %v44_v21 = vmul.f32 %v156_v1, %v21_v17  ;;  %v23_v27 = vld [vmem:[%s288_s0 + $0x48] sm:$0xff]  ;;  %v24_v28 = vld [vmem:[%s288_s0 + $0x50] sm:$0xff] }
   0x5   :  { %v60_v13 = vadd.f32 %v161_v2, %v37_v3  ;;  %v41_v14 = vmul.f32 %v156_v1, %v18_v10  ;;  %v61_v18 = vadd.f32 %v161_v2, %v38_v7  ;;  %v62_v19 = vadd.f32 %v161_v2, %v39_v8  ;;  %v22_v22 = vld [vmem:[%s288_s0 + $0x40] sm:$0xff]  ;;  %v25_v29 = vld [vmem:[%s288_s0 + $0x58] sm:$0xff]  ;;  %v27_v43 = vld [vmem:[%s288_s0 + $0x68] sm:$0xff] }
   0x6   :  { %v63_v20 = vadd.f32 %v161_v2, %v40_v9  ;;  %v65_v25 = vadd.f32 %v161_v2, %v42_v15  ;;  %v66_v26 = vadd.f32 %v161_v2, %v43_v16  ;;  %v67_v33 = vadd.f32 %v161_v2, %v44_v21  ;;  %v26_v42 = vld [vmem:[%s288_s0 + $0x60] sm:$0xff]  ;;  %v28_v44 = vld [vmem:[%s288_s0 + $0x70] sm:$0xff]  ;;  %v29_v49 = vld [vmem:[%s288_s0 + $0x78] sm:$0xff] }
   0x7   :  { %v76_v23 = vmul.f32 0.2, %v60_v13  ;;  %v64_v24 = vadd.f32 %v161_v2, %v41_v14  ;;  %v77_v30 = vmul.f32 0.2, %v61_v18  ;;  %v78_v31 = vmul.f32 0.2, %v62_v19 }
   0x8   :  { %v79_v32 = vmul.f32 0.2, %v63_v20  ;;  %v81_v36 = vmul.f32 0.2, %v65_v25  ;;  %v82_v37 = vmul.f32 0.2, %v66_v26  ;;  %v45_v48 = vmul.f32 %v156_v1, %v22_v22 }
   0x9   :  { %v92_v34 = vmax.f32 %v60_v13, %v76_v23  ;;  %v80_v35 = vmul.f32 0.2, %v64_v24  ;;  %v93_v38 = vmax.f32 %v61_v18, %v77_v30  ;;  %v94_v39 = vmax.f32 %v62_v19, %v78_v31 }
   0xa   :  { %v95_v40 = vmax.f32 %v63_v20, %v79_v32  ;;  %v83_v41 = vmul.f32 0.2, %v67_v33  ;;  %v97_v46 = vmax.f32 %v65_v25, %v81_v36  ;;  %v98_v47 = vmax.f32 %v66_v26, %v82_v37 }
   0xb   :  { %108 = vst [vmem:[%s291_s3] sm:$0xff] %v92_v34  ;;  %v96_v45 = vmax.f32 %v64_v24, %v80_v35  ;;  %109 = vst [vmem:[%s291_s3 + $0x8] sm:$0xff] %v93_v38  ;;  %v46_v51 = vmul.f32 %v156_v1, %v23_v27  ;;  %v47_v52 = vmul.f32 %v156_v1, %v24_v28 }
   0xc   :  { %110 = vst [vmem:[%s291_s3 + $0x10] sm:$0xff] %v94_v39  ;;  %111 = vst [vmem:[%s291_s3 + $0x18] sm:$0xff] %v95_v40  ;;  %v99_v50 = vmax.f32 %v67_v33, %v83_v41  ;;  %v48_v53 = vmul.f32 %v156_v1, %v25_v29  ;;  %v68_v54 = vadd.f32 %v161_v2, %v45_v48 }
   0xd   :  { %112 = vst [vmem:[%s291_s3 + $0x20] sm:$0xff] %v96_v45  ;;  %113 = vst [vmem:[%s291_s3 + $0x28] sm:$0xff] %v97_v46  ;;  %v49_v55 = vmul.f32 %v156_v1, %v26_v42  ;;  %v50_v56 = vmul.f32 %v156_v1, %v27_v43  ;;  %v51_v57 = vmul.f32 %v156_v1, %v28_v44 }
   0xe   :  { %114 = vst [vmem:[%s291_s3 + $0x30] sm:$0xff] %v98_v47  ;;  %115 = vst [vmem:[%s291_s3 + $0x38] sm:$0xff] %v99_v50  ;;  %v69_v58 = vadd.f32 %v161_v2, %v46_v51  ;;  %v70_v59 = vadd.f32 %v161_v2, %v47_v52  ;;  %v71_v60 = vadd.f32 %v161_v2, %v48_v53  ;;  %v84_v62 = vmul.f32 0.2, %v68_v54 }
   0xf   :  { %v52_v61 = vmul.f32 %v156_v1, %v29_v49  ;;  %v72_v63 = vadd.f32 %v161_v2, %v49_v55  ;;  %v73_v0 = vadd.f32 %v161_v2, %v50_v56  ;;  %v74_v3 = vadd.f32 %v161_v2, %v51_v57 }
  0x10   :  { %v85_v4 = vmul.f32 0.2, %v69_v58  ;;  %v86_v5 = vmul.f32 0.2, %v70_v59  ;;  %v87_v6 = vmul.f32 0.2, %v71_v60  ;;  %v100_v8 = vmax.f32 %v68_v54, %v84_v62 }
  0x11   :  { %v75_v7 = vadd.f32 %v161_v2, %v52_v61  ;;  %v88_v9 = vmul.f32 0.2, %v72_v63  ;;  %v89_v10 = vmul.f32 0.2, %v73_v0  ;;  %v90_v11 = vmul.f32 0.2, %v74_v3 }
  0x12   :  { %v101_v12 = vmax.f32 %v69_v58, %v85_v4  ;;  %v102_v13 = vmax.f32 %v70_v59, %v86_v5  ;;  %v103_v14 = vmax.f32 %v71_v60, %v87_v6  ;;  %116 = vst [vmem:[%s291_s3 + $0x40] sm:$0xff] %v100_v8 }
  0x13   :  { %v91_v1 = vmul.f32 0.2, %v75_v7  ;;  %v104_v15 = vmax.f32 %v72_v63, %v88_v9  ;;  %v105_v16 = vmax.f32 %v73_v0, %v89_v10  ;;  %v106_v17 = vmax.f32 %v74_v3, %v90_v11 }
  0x14   :  { %117 = vst [vmem:[%s291_s3 + $0x48] sm:$0xff] %v101_v12  ;;  %118 = vst [vmem:[%s291_s3 + $0x50] sm:$0xff] %v102_v13 }
  0x15   :  { %119 = vst [vmem:[%s291_s3 + $0x58] sm:$0xff] %v103_v14  ;;  %v107_v2 = vmax.f32 %v75_v7, %v91_v1  ;;  %120 = vst [vmem:[%s291_s3 + $0x60] sm:$0xff] %v104_v15 }
  0x16   :  { %121 = vst [vmem:[%s291_s3 + $0x68] sm:$0xff] %v105_v16  ;;  %122 = vst [vmem:[%s291_s3 + $0x70] sm:$0xff] %v106_v17 }
  0x17   :  { %123 = vst [vmem:[%s291_s3 + $0x78] sm:$0xff] %v107_v2 }

// kernel: downsample_forward.2
= control target key start
LH: loop header
LB: loop body
LE: loop exit
PB: predicated region body
PF: predicated region fallthrough
CT: control target
= control target key end

     0   :  { %vm313_vm0 = vcmask 1040384   ;;  %vm315_vm1 = vcmask 1041408   ;;  %s541_s1 = inlined_call_operand.vmem [shape: bf16[128,128], index: 1, kind: input, shape index: {}]   ;;  %s542_s0 = inlined_call_operand.vmem [shape: bf16[128,128], index: 0, kind: input, shape index: {}]   ;;  %s543_s2 = inlined_call_operand.vmem [shape: f32[128,128], index: 2, kind: output, shape index: {0}]   ;;  %s544_s3 = inlined_call_operand.vmem [shape: f32[1,8,128], index: 3, kind: output, shape index: {1}]  }
   0x1   :  { %v406_v0 = vld [vmem:[%s541_s1] sm:$0xff]   ;;  %v407_v1 = vld [vmem:[%s541_s1 + $0x8] sm:$0xff]   ;;  %v408_v2 = vld [vmem:[%s541_s1 + $0x10] sm:$0xff]  }
   0x2   :  { %358 = vmatprep.subr.bf16.mxu0 %v406_v0  ;;  %390 = vmatprep.subr.bf16.mxu1 %v406_v0  ;;  %v409_v3 = vld [vmem:[%s541_s1 + $0x18] sm:$0xff]   ;;  %v414_v4 = vld [vmem:[%s542_s0] sm:$0xff]   ;;  %v411_v7 = vld [vmem:[%s541_s1 + $0x28] sm:$0xff]  }
   0x3   :  { %359 = vmatpush3.bf16.msra.mxu0 %v406_v0  ;;  %398 = vmatpush3.bf16.msra.mxu1 %v406_v0  ;;  %v410_v5 = vld [vmem:[%s541_s1 + $0x20] sm:$0xff]   ;;  %v412_v8 = vld [vmem:[%s541_s1 + $0x30] sm:$0xff]   ;;  %v413_v9 = vld [vmem:[%s541_s1 + $0x38] sm:$0xff]  }
   0x4   :  { %360 = vmatprep.subr.bf16.mxu0 %v407_v1  ;;  %391 = vmatprep.subr.bf16.mxu1 %v407_v1  ;;  %v418_v6 = vld [vmem:[%s542_s0 + $0x20] sm:$0xff]   ;;  %v415_v10 = vld [vmem:[%s542_s0 + $0x8] sm:$0xff]   ;;  %v416_v12 = vld [vmem:[%s542_s0 + $0x10] sm:$0xff]  }
   0x5   :  { %374 = vmatprep.mubr.bf16.mxu0 %v414_v4  ;;  %382 = vmatprep.mubr.bf16.mxu1 %v418_v6  ;;  %v419_v11 = vld [vmem:[%s542_s0 + $0x28] sm:$0xff]   ;;  %v420_v13 = vld [vmem:[%s542_s0 + $0x30] sm:$0xff]   ;;  %v417_v14 = vld [vmem:[%s542_s0 + $0x18] sm:$0xff]  }
   0x6   :  { %v421_v15 = vld [vmem:[%s542_s0 + $0x38] sm:$0xff]  }
   0x7   :  { %361 = vmatpush3.bf16.msra.mxu0 %v407_v1  ;;  %399 = vmatpush3.bf16.msra.mxu1 %v407_v1 }
   0x8   :  { %362 = vmatprep.subr.bf16.mxu0 %v408_v2  ;;  %392 = vmatprep.subr.bf16.mxu1 %v408_v2 }
   0xb   :  { %363 = vmatpush3.bf16.msra.mxu0 %v408_v2  ;;  %400 = vmatpush3.bf16.msra.mxu1 %v408_v2 }
   0xc   :  { %364 = vmatprep.subr.bf16.mxu0 %v409_v3  ;;  %393 = vmatprep.subr.bf16.mxu1 %v409_v3 }
   0xf   :  { %365 = vmatpush3.bf16.msra.mxu0 %v409_v3  ;;  %401 = vmatpush3.bf16.msra.mxu1 %v409_v3 }
  0x10   :  { %366 = vmatprep.subr.bf16.mxu0 %v410_v5  ;;  %394 = vmatprep.subr.bf16.mxu1 %v410_v5 }
  0x13   :  { %367 = vmatpush3.bf16.msra.mxu0 %v410_v5  ;;  %402 = vmatpush3.bf16.msra.mxu1 %v410_v5 }
  0x14   :  { %368 = vmatprep.subr.bf16.mxu0 %v411_v7  ;;  %395 = vmatprep.subr.bf16.mxu1 %v411_v7 }
  0x17   :  { %369 = vmatpush3.bf16.msra.mxu0 %v411_v7  ;;  %403 = vmatpush3.bf16.msra.mxu1 %v411_v7 }
  0x18   :  { %370 = vmatprep.subr.bf16.mxu0 %v412_v8  ;;  %396 = vmatprep.subr.bf16.mxu1 %v412_v8 }
  0x1b   :  { %371 = vmatpush3.bf16.msra.mxu0 %v412_v8  ;;  %404 = vmatpush3.bf16.msra.mxu1 %v412_v8 }
  0x1c   :  { %372 = vmatprep.subr.bf16.mxu0 %v413_v9  ;;  %397 = vmatprep.subr.bf16.mxu1 %v413_v9 }
  0x1f   :  { %373 = vmatpush3.bf16.msra.mxu0 %v413_v9  ;;  %405 = vmatpush3.bf16.msra.mxu1 %v413_v9 }
  0x22   :  { %375 = vmatmul.mubr.bf16.vlgmr.msra.gmra.mrb[0].mxu0 %v415_v10  ;;  %383 = vmatmul.mubr.bf16.vlgmr.msra.gmra.mrb[0].mxu1 %v419_v11 }
  0x23   :  { %378 = vmatprep.mubr.bf16.mxu0 %v416_v12  ;;  %386 = vmatprep.mubr.bf16.mxu1 %v420_v13 }
  0x2a   :  { %379 = vmatmul.mubr.bf16.gmra.mrb[4].mxu0 %v417_v14  ;;  %387 = vmatmul.mubr.bf16.gmra.mrb[4].mxu1 %v421_v15 }
  0xf5   :  { %v376_v16 = vpop.f32.mrb[0].mxu0  ;;  %v384_v17 = vpop.f32.mrb[0].mxu1 }
  0xf6   :  { %241 = vst [vmem:[%s543_s2 + $0x10] sm:$0xff] %v376_v16  ;;  %v176_v18 = vpop.f32.mrb[1].mxu0  ;;  %249 = vst [vmem:[%s543_s2 + $0x50] sm:$0xff] %v384_v17  ;;  %v208_v19 = vpop.f32.mrb[1].mxu1  ;;  %v278_v27 = vmul.f32 %v376_v16, %v376_v16  ;;  %v286_v59 = vmul.f32 %v384_v17, %v384_v17 }
  0xf7   :  { %239 = vst [vmem:[%s543_s2] sm:$0xff] %v176_v18  ;;  %v377_v20 = vpop.f32.mrb[2].mxu0  ;;  %247 = vst [vmem:[%s543_s2 + $0x40] sm:$0xff] %v208_v19  ;;  %v385_v21 = vpop.f32.mrb[2].mxu1  ;;  %v276_v24 = vmul.f32 %v176_v18, %v176_v18  ;;  %v284_v53 = vmul.f32 %v208_v19, %v208_v19 }
  0xf8   :  { %242 = vst [vmem:[%s543_s2 + $0x18] sm:$0xff] %v377_v20  ;;  %v179_v22 = vpop.f32.mrb[3].mxu0  ;;  %250 = vst [vmem:[%s543_s2 + $0x58] sm:$0xff] %v385_v21  ;;  %v211_v23 = vpop.f32.mrb[3].mxu1  ;;  %v279_v30 = vmul.f32 %v377_v20, %v377_v20  ;;  %v287_v62 = vmul.f32 %v385_v21, %v385_v21 }
  0xf9   :  { %240 = vst [vmem:[%s543_s2 + $0x8] sm:$0xff] %v179_v22  ;;  %v255_v25 = vadd.f32 %v179_v22, %v176_v18  ;;  %v277_v26 = vmul.f32 %v179_v22, %v179_v22  ;;  %248 = vst [vmem:[%s543_s2 + $0x48] sm:$0xff] %v211_v23  ;;  %v285_v58 = vmul.f32 %v211_v23, %v211_v23 }
  0xfb   :  { %v256_v28 = vadd.f32 %v376_v16, %v255_v25  ;;  %v292_v29 = vadd.f32 %v277_v26, %v276_v24 }
  0xfd   :  { %v293_v31 = vadd.f32 %v292_v29, %v278_v27  ;;  %v380_v32 = vpop.f32.mrb[4].mxu0  ;;  %v257_v33 = vadd.f32 %v377_v20, %v256_v28  ;;  %v388_v34 = vpop.f32.mrb[4].mxu1 }
  0xfe   :  { %245 = vst [vmem:[%s543_s2 + $0x30] sm:$0xff] %v380_v32  ;;  %v192_v35 = vpop.f32.mrb[5].mxu0  ;;  %253 = vst [vmem:[%s543_s2 + $0x70] sm:$0xff] %v388_v34  ;;  %v224_v36 = vpop.f32.mrb[5].mxu1  ;;  %v282_v47 = vmul.f32 %v380_v32, %v380_v32  ;;  %v290_v7 = vmul.f32 %v388_v34, %v388_v34 }
  0xff   :  { %243 = vst [vmem:[%s543_s2 + $0x20] sm:$0xff] %v192_v35  ;;  %v258_v37 = vadd.f32 %v257_v33, %v192_v35  ;;  %v280_v38 = vmul.f32 %v192_v35, %v192_v35  ;;  %v294_v39 = vadd.f32 %v293_v31, %v279_v30  ;;  %v381_v40 = vpop.f32.mrb[6].mxu0  ;;  %251 = vst [vmem:[%s543_s2 + $0x60] sm:$0xff] %v224_v36  ;;  %v389_v41 = vpop.f32.mrb[6].mxu1 }
 0x100   :  { %246 = vst [vmem:[%s543_s2 + $0x38] sm:$0xff] %v381_v40  ;;  %v195_v42 = vpop.f32.mrb[7].mxu0  ;;  %254 = vst [vmem:[%s543_s2 + $0x78] sm:$0xff] %v389_v41  ;;  %v227_v43 = vpop.f32.mrb[7].mxu1  ;;  %v283_v50 = vmul.f32 %v381_v40, %v381_v40  ;;  %v288_v1 = vmul.f32 %v224_v36, %v224_v36  ;;  %v291_v10 = vmul.f32 %v389_v41, %v389_v41 }
 0x101   :  { %v295_v44 = vadd.f32 %v294_v39, %v280_v38  ;;  %244 = vst [vmem:[%s543_s2 + $0x28] sm:$0xff] %v195_v42  ;;  %v259_v45 = vadd.f32 %v258_v37, %v195_v42  ;;  %v281_v46 = vmul.f32 %v195_v42, %v195_v42  ;;  %252 = vst [vmem:[%s543_s2 + $0x68] sm:$0xff] %v227_v43 }
 0x102   :  { %v289_v6 = vmul.f32 %v227_v43, %v227_v43 }
 0x103   :  { %v260_v48 = vadd.f32 %v380_v32, %v259_v45  ;;  %v296_v49 = vadd.f32 %v295_v44, %v281_v46 }
 0x105   :  { %v297_v51 = vadd.f32 %v296_v49, %v282_v47  ;;  %v261_v52 = vadd.f32 %v381_v40, %v260_v48 }
 0x107   :  { %v262_v54 = vadd.f32 %v261_v52, %v208_v19  ;;  %v298_v55 = vadd.f32 %v297_v51, %v283_v50 }
 0x109   :  { %v299_v56 = vadd.f32 %v298_v55, %v284_v53  ;;  %v263_v57 = vadd.f32 %v262_v54, %v211_v23 }
 0x10b   :  { %v264_v60 = vadd.f32 %v384_v17, %v263_v57  ;;  %v300_v61 = vadd.f32 %v299_v56, %v285_v58 }
 0x10d   :  { %v301_v63 = vadd.f32 %v300_v61, %v286_v59  ;;  %v265_v0 = vadd.f32 %v385_v21, %v264_v60 }
 0x10f   :  { %v266_v2 = vadd.f32 %v265_v0, %v224_v36  ;;  %v302_v3 = vadd.f32 %v301_v63, %v287_v62 }
 0x111   :  { %v303_v4 = vadd.f32 %v302_v3, %v288_v1  ;;  %v267_v5 = vadd.f32 %v266_v2, %v227_v43 }
 0x113   :  { %v268_v8 = vadd.f32 %v388_v34, %v267_v5  ;;  %v304_v9 = vadd.f32 %v303_v4, %v289_v6 }
 0x115   :  { %v269_v11 = vadd.f32 %v389_v41, %v268_v8  ;;  %v305_v12 = vadd.f32 %v304_v9, %v290_v7 }
 0x117   :  { %v270_v13 = vrot.slane %v269_v11, 4  ;;  %v306_v14 = vadd.f32 %v305_v12, %v291_v10 }
 0x119   :  { %v271_v15 = vadd.f32 %v270_v13, %v269_v11  ;;  %v307_v16 = vrot.slane %v306_v14, 4 }
 0x11b   :  { %v272_v17 = vrot.slane %v271_v15, 2  ;;  %v308_v18 = vadd.f32 %v307_v16, %v306_v14 }
 0x11d   :  { %v273_v19 = vadd.f32 %v272_v17, %v271_v15  ;;  %v309_v20 = vrot.slane %v308_v18, 2 }
 0x11f   :  { %v274_v21 = vrot.slane %v273_v19, 1  ;;  %v310_v22 = vadd.f32 %v309_v20, %v308_v18 }
 0x121   :  { %v311_v23 = vrot.slane %v310_v22, 1  ;;  %v275_v24 = vadd.f32 %v274_v21, %v273_v19 }
 0x123   :  { %v312_v25 = vadd.f32 %v311_v23, %v310_v22 }
 0x125   :  { %v314_v26 = vsel %vm313_vm0, %v275_v24, %v312_v25 }
 0x126   :  { %v316_v27 = vsel %vm315_vm1, %v314_v26, 0.0 }
 0x127   :  { %317 = vst [vmem:[%s544_s3] sm:$0xff] %v316_v27 }

</bundles_post_ra>
